<compile_context>
chip_gen: v7x
topology: tpu7x:2x2x1
jax: 0.10.0
libtpu: 0.0.40
codegen_flags: <defaults>
</compile_context>

<pallas_src>
import jax
import jax.numpy as jnp
from jax.experimental import pallas as pl
from jax.experimental.pallas import tpu as pltpu


def _pr_kernel(a_ref, g1_ref, g2_ref, w2_ref, e2_ref, o1_ref, x2_ref):
    """One batch tile per grid step.

    Block views:
      a_ref  : (TB, 1, 2*I*T)   [Re(fft(x)) | Im(fft(x))], (i,t) row-major
      g1_ref : (I, 2*O, T)      per-i [ Hs_r ; Hs_i ]   (weight-only, resident)
      g2_ref : (I, 2*O, T)      per-i [ -Hs_i ; Hs_r ]
      w2_ref : (2*I*T, 2*O*K)   packed residue2 weights (minus sign folded)
      e2_ref : (2*O*K, O*T)     packed term2 (1/T scale folded)
      o1_ref : (TB, 2*O, T)     [ Re(output_residue1) ; Im(output_residue1) ]
      x2_ref : (TB, 1, O*T)     real x2 slab (lane-dense), reshaped in wrapper
    """
    f32 = jnp.float32
    I, twoO, T = g1_ref.shape

    a = a_ref[...][:, 0, :]                       # (TB, 2*I*T)

    # ---- output_residue1[o,t] = sum_i alpha[i,t] * Hs[i,o,t]   (VPU) -------
    # Accumulate over input channels directly into the VMEM output block;
    # real part lives in rows [:O], imaginary part in rows [O:].
    for i in range(I):
        ar_i = a[:, i * T:(i + 1) * T][:, None, :]              # (TB, 1, T)
        ai_i = a[:, (I + i) * T:(I + i + 1) * T][:, None, :]    # (TB, 1, T)
        contrib = ar_i * g1_ref[i][None] + ai_i * g2_ref[i][None]   # (TB, 2*O, T)
        if i == 0:
            o1_ref[...] = contrib
        else:
            o1_ref[...] += contrib

    # ---- output_residue2 + x2 synthesis: two packed real MXU matmuls -------
    # o2 = [Re(output_residue2) | Im(output_residue2)]  (minus sign already in w2)
    o2 = jnp.dot(a, w2_ref[...], preferred_element_type=f32)        # (TB, 2*O*K)
    xf = jnp.dot(o2, e2_ref[...], preferred_element_type=f32)       # (TB, O*T)
    x2_ref[...] = xf[:, None, :]


def _choose_batch_tile(B):
    """Fill the MXU M dimension while keeping >= 2 grid steps (megacore)."""
    if B <= 1:
        return max(B, 1)
    tb = min(128, B)
    if -(-B // tb) < 2:          # fewer than 2 grid steps -> split batch in two
        tb = -(-B // 2)
    return tb


def pr_forward(x, t, weights_pole, weights_residue, *, batch_tile=None):
    """x: (B, I, T) float32; t: (T,) float32; weights: (I, O, K) complex64."""
    B, I, T = x.shape
    Ip, O, K = weights_pole.shape
    assert Ip == I
    # The x2 stage feeds output_residue2's out-channel axis into term2's
    # in-channel axis (mirrors the torch einsum 'bix,ioxz->boz').
    assert I == O, "PR forward requires in_channels == out_channels"
    f32, c64 = jnp.float32, jnp.complex64

    # ---------------- JAX glue: FFT (no Pallas FFT primitive) ----------------
    alpha = jnp.fft.fft(x)                                     # (B, I, T) c64
    ar = jnp.real(alpha).astype(f32).reshape(B, I * T)
    ai = jnp.imag(alpha).astype(f32).reshape(B, I * T)
    a_flat = jnp.concatenate([ar, ai], axis=1)[:, None, :]     # (B, 1, 2*I*T)

    # ---------------- weight-only spectral prep (hoisted, no x dependence) ---
    dt = (t[1] - t[0]).astype(f32)                             # trace-safe (no float())
    lam = (2j * jnp.pi * (jnp.fft.fftfreq(T).astype(f32) / dt)).astype(c64)  # (T,), Re == 0
    pole = weights_pole.astype(c64)
    residue = weights_residue.astype(c64)

    # Hw[i,o,k,t] = residue / (lambda - pole);  Hs = sum_k Hw
    Hw = residue[..., None] / (lam[None, None, None, :] - pole[..., None])   # (I,O,K,T)
    Hs = jnp.sum(Hw, axis=2)                                                 # (I,O,T)
    hs_r = jnp.real(Hs).astype(f32)
    hs_i = jnp.imag(Hs).astype(f32)
    g1 = jnp.concatenate([hs_r, hs_i], axis=1)                 # (I, 2*O, T)
    g2 = jnp.concatenate([-hs_i, hs_r], axis=1)                # (I, 2*O, T)

    # Packed residue2 weights: rows indexed by (i,t) (contraction on sublane),
    # cols by (o,k); output_residue2 minus sign folded in.
    Hw_mat = jnp.transpose(Hw, (0, 3, 1, 2)).reshape(I * T, O * K)
    hw_r = jnp.real(Hw_mat).astype(f32)
    hw_i = jnp.imag(Hw_mat).astype(f32)
    w2 = jnp.concatenate(
        [jnp.concatenate([-hw_r, -hw_i], axis=1),
         jnp.concatenate([hw_i, -hw_r], axis=1)], axis=0)      # (2*I*T, 2*O*K)

    # Packed term2 for x2 synthesis: rows (c,k), cols (o,t); 1/T folded in.
    term2 = jnp.exp(pole[..., None] * t.astype(c64)[None, None, None, :])    # (I,O,K,T)
    E2 = jnp.transpose(term2, (0, 2, 1, 3)).reshape(I * K, O * T)
    e2 = (jnp.concatenate([jnp.real(E2), -jnp.imag(E2)], axis=0)
          .astype(f32) * (1.0 / T))                            # (2*O*K, O*T)

    # ---------------- batch tiling -------------------------------------------
    tb = _choose_batch_tile(B) if batch_tile is None else batch_tile
    n_steps = pl.cdiv(B, tb)
    Bp = n_steps * tb
    if Bp != B:
        a_flat = jnp.pad(a_flat, ((0, Bp - B), (0, 0), (0, 0)))

    in_specs = [
        pl.BlockSpec((tb, 1, 2 * I * T), lambda b: (b, 0, 0)),       # alpha (batched)
        pl.BlockSpec((I, 2 * O, T), lambda b: (0, 0, 0)),            # g1 (resident)
        pl.BlockSpec((I, 2 * O, T), lambda b: (0, 0, 0)),            # g2 (resident)
        pl.BlockSpec((2 * I * T, 2 * O * K), lambda b: (0, 0)),      # w2 (resident)
        pl.BlockSpec((2 * O * K, O * T), lambda b: (0, 0)),          # e2 (resident)
    ]
    out_specs = (
        pl.BlockSpec((tb, 2 * O, T), lambda b: (b, 0, 0)),           # [o1r ; o1i]
        pl.BlockSpec((tb, 1, O * T), lambda b: (b, 0, 0)),           # x2 slab
    )
    out_shape = (
        jax.ShapeDtypeStruct((Bp, 2 * O, T), f32),
        jax.ShapeDtypeStruct((Bp, 1, O * T), f32),
    )

    o1_pk, x2f = pl.pallas_call(
        _pr_kernel,
        grid=(n_steps,),
        in_specs=in_specs,
        out_specs=out_specs,
        out_shape=out_shape,
        compiler_params=pltpu.CompilerParams(
            dimension_semantics=("parallel",),
            vmem_limit_bytes=64 * 1024 * 1024,
        ),
    )(a_flat, g1, g2, w2, e2)

    # TODO(synk): no Pallas IFFT primitive on TPU -> ifft stays in JAX glue.
    o1 = o1_pk[:B, :O, :] + 1j * o1_pk[:B, O:, :]
    x1 = jnp.real(jnp.fft.ifft(o1, n=T))
    x2 = x2f[:B, 0, :].reshape(B, O, T)
    return x1 + x2


def pr_forward_ref(x, t, pole, residue):
    """Pure-JAX reference mirroring the PyTorch forward."""
    B, I, T = x.shape
    alpha = jnp.fft.fft(x)
    dt = (t[1] - t[0]).astype(jnp.float32)
    lam = (2j * jnp.pi * (jnp.fft.fftfreq(T).astype(jnp.float32) / dt)).astype(jnp.complex64)
    lam1 = lam.reshape(T, 1, 1, 1)
    Hw = residue / (lam1 - pole)                          # (T, I, O, K)
    out1 = jnp.einsum('bix,xiok->box', alpha, Hw)
    out2 = jnp.einsum('bix,xiok->bok', alpha, -Hw)
    x1 = jnp.real(jnp.fft.ifft(out1, n=T))
    term2 = jnp.exp(jnp.einsum('iok,z->iokz', pole, t.astype(jnp.complex64)))
    x2 = jnp.real(jnp.einsum('bik,iokz->boz', out2, term2)) / T
    return x1 + x2


if __name__ == "__main__":
    # PR(in_channels=4, out_channels=4, modes1=8); the torch einsum
    # 'bix,ioxz->boz' implicitly requires in_channels == out_channels.
    B, I, O, K, T = 2, 4, 4, 8, 16
    key = jax.random.PRNGKey(0)
    k1, k2, k3, k4, k5 = jax.random.split(key, 5)
    scale = 1.0 / (I * O)
    weights_pole = (scale * (jax.random.uniform(k1, (I, O, K))
                             + 1j * jax.random.uniform(k2, (I, O, K)))).astype(jnp.complex64)
    weights_residue = (scale * (jax.random.uniform(k3, (I, O, K))
                                + 1j * jax.random.uniform(k4, (I, O, K)))).astype(jnp.complex64)
    x = jax.random.normal(k5, (B, I, T), dtype=jnp.float32)
    t = jnp.linspace(0.0, 1.5, T, dtype=jnp.float32)   # stand-in for grid_x_train

    out = pr_forward(x, t, weights_pole, weights_residue)
    out = jax.block_until_ready(out)

    ref = pr_forward_ref(x, t, weights_pole, weights_residue)
    err = float(jnp.max(jnp.abs(out - ref)))
    assert out.shape == (B, O, T) and out.dtype == jnp.float32
    assert err < 2e-2, f"max abs err {err}"
    print("KERNEL_OK")
</pallas_src>

<mosaic_0001>
module attributes {stable_mosaic.version = 11 : i64} {
  func.func @_pr_kernel(%arg0: i32, %arg1: memref<1x1x128xf32, #tpu.memory_space<vmem>>, %arg2: memref<4x8x16xf32, #tpu.memory_space<vmem>>, %arg3: memref<4x8x16xf32, #tpu.memory_space<vmem>>, %arg4: memref<128x64xf32, #tpu.memory_space<vmem>>, %arg5: memref<64x64xf32, #tpu.memory_space<vmem>>, %arg6: memref<1x8x16xf32, #tpu.memory_space<vmem>>, %arg7: memref<1x1x64xf32, #tpu.memory_space<vmem>>) attributes {dimension_semantics = [#tpu.dimension_semantics<parallel>], iteration_bounds = array<i64: 2>, scalar_prefetch = 0 : i64, scratch_operands = 0 : i64, tpu.core_type = #tpu.core_type<tc>, window_params = [{transform_indices = @transform_0, window_bounds = array<i64: 1, 1, 128>}, {pipeline_mode = #tpu.pipeline_mode<synchronous>, transform_indices = @transform_1, window_bounds = array<i64: 4, 8, 16>}, {pipeline_mode = #tpu.pipeline_mode<synchronous>, transform_indices = @transform_2, window_bounds = array<i64: 4, 8, 16>}, {pipeline_mode = #tpu.pipeline_mode<synchronous>, transform_indices = @transform_3, window_bounds = array<i64: 128, 64>}, {pipeline_mode = #tpu.pipeline_mode<synchronous>, transform_indices = @transform_4, window_bounds = array<i64: 64, 64>}, {transform_indices = @transform_5, window_bounds = array<i64: 1, 8, 16>}, {transform_indices = @transform_6, window_bounds = array<i64: 1, 1, 64>}]} {
    %c0 = arith.constant 0 : index
    %c0_0 = arith.constant 0 : index
    %c0_1 = arith.constant 0 : index
    %0 = vector.load %arg1[%c0, %c0_0, %c0_1] : memref<1x1x128xf32, #tpu.memory_space<vmem>>, vector<1x1x128xf32>
    %1 = vector.shape_cast %0 : vector<1x1x128xf32> to vector<1x128xf32>
    %2 = vector.extract_strided_slice %1 {offsets = [0, 0], sizes = [1, 16], strides = [1, 1]} : vector<1x128xf32> to vector<1x16xf32>
    %3 = vector.shape_cast %2 : vector<1x16xf32> to vector<1x1x16xf32>
    %4 = vector.extract_strided_slice %1 {offsets = [0, 64], sizes = [1, 16], strides = [1, 1]} : vector<1x128xf32> to vector<1x16xf32>
    %5 = vector.shape_cast %4 : vector<1x16xf32> to vector<1x1x16xf32>
    %c0_2 = arith.constant 0 : index
    %c0_3 = arith.constant 0 : index
    %c0_4 = arith.constant 0 : index
    %6 = vector.load %arg2[%c0_2, %c0_3, %c0_4] : memref<4x8x16xf32, #tpu.memory_space<vmem>>, vector<1x8x16xf32>
    %7 = vector.shape_cast %6 : vector<1x8x16xf32> to vector<8x16xf32>
    %8 = vector.shape_cast %7 : vector<8x16xf32> to vector<1x8x16xf32>
    %9 = vector.broadcast %3 : vector<1x1x16xf32> to vector<1x8x16xf32>
    %10 = arith.mulf %9, %8 : vector<1x8x16xf32>
    %c0_5 = arith.constant 0 : index
    %c0_6 = arith.constant 0 : index
    %c0_7 = arith.constant 0 : index
    %11 = vector.load %arg3[%c0_5, %c0_6, %c0_7] : memref<4x8x16xf32, #tpu.memory_space<vmem>>, vector<1x8x16xf32>
    %12 = vector.shape_cast %11 : vector<1x8x16xf32> to vector<8x16xf32>
    %13 = vector.shape_cast %12 : vector<8x16xf32> to vector<1x8x16xf32>
    %14 = vector.broadcast %5 : vector<1x1x16xf32> to vector<1x8x16xf32>
    %15 = arith.mulf %14, %13 : vector<1x8x16xf32>
    %16 = arith.addf %10, %15 : vector<1x8x16xf32>
    %c0_8 = arith.constant 0 : index
    %c0_9 = arith.constant 0 : index
    %c0_10 = arith.constant 0 : index
    %17 = vector.load %arg6[%c0_8, %c0_9, %c0_10] : memref<1x8x16xf32, #tpu.memory_space<vmem>>, vector<1x8x16xf32>
    tpu.vector_store %arg6[%c0_8, %c0_9, %c0_10], %16 {strides = array<i32>} : memref<1x8x16xf32, #tpu.memory_space<vmem>>, vector<1x8x16xf32>,
    %18 = vector.extract_strided_slice %1 {offsets = [0, 16], sizes = [1, 16], strides = [1, 1]} : vector<1x128xf32> to vector<1x16xf32>
    %19 = vector.shape_cast %18 : vector<1x16xf32> to vector<1x1x16xf32>
    %20 = vector.extract_strided_slice %1 {offsets = [0, 80], sizes = [1, 16], strides = [1, 1]} : vector<1x128xf32> to vector<1x16xf32>
    %21 = vector.shape_cast %20 : vector<1x16xf32> to vector<1x1x16xf32>
    %c1 = arith.constant 1 : index
    %c0_11 = arith.constant 0 : index
    %c0_12 = arith.constant 0 : index
    %22 = vector.load %arg2[%c1, %c0_11, %c0_12] : memref<4x8x16xf32, #tpu.memory_space<vmem>>, vector<1x8x16xf32>
    %23 = vector.shape_cast %22 : vector<1x8x16xf32> to vector<8x16xf32>
    %24 = vector.shape_cast %23 : vector<8x16xf32> to vector<1x8x16xf32>
    %25 = vector.broadcast %19 : vector<1x1x16xf32> to vector<1x8x16xf32>
    %26 = arith.mulf %25, %24 : vector<1x8x16xf32>
    %c1_13 = arith.constant 1 : index
    %c0_14 = arith.constant 0 : index
    %c0_15 = arith.constant 0 : index
    %27 = vector.load %arg3[%c1_13, %c0_14, %c0_15] : memref<4x8x16xf32, #tpu.memory_space<vmem>>, vector<1x8x16xf32>
    %28 = vector.shape_cast %27 : vector<1x8x16xf32> to vector<8x16xf32>
    %29 = vector.shape_cast %28 : vector<8x16xf32> to vector<1x8x16xf32>
    %30 = vector.broadcast %21 : vector<1x1x16xf32> to vector<1x8x16xf32>
    %31 = arith.mulf %30, %29 : vector<1x8x16xf32>
    %32 = arith.addf %26, %31 : vector<1x8x16xf32>
    %c0_16 = arith.constant 0 : index
    %c0_17 = arith.constant 0 : index
    %c0_18 = arith.constant 0 : index
    %33 = vector.load %arg6[%c0_16, %c0_17, %c0_18] : memref<1x8x16xf32, #tpu.memory_space<vmem>>, vector<1x8x16xf32>
    %34 = arith.addf %33, %32 : vector<1x8x16xf32>
    %c0_19 = arith.constant 0 : index
    %c0_20 = arith.constant 0 : index
    %c0_21 = arith.constant 0 : index
    %35 = vector.load %arg6[%c0_19, %c0_20, %c0_21] : memref<1x8x16xf32, #tpu.memory_space<vmem>>, vector<1x8x16xf32>
    tpu.vector_store %arg6[%c0_19, %c0_20, %c0_21], %34 {strides = array<i32>} : memref<1x8x16xf32, #tpu.memory_space<vmem>>, vector<1x8x16xf32>,
    %36 = vector.extract_strided_slice %1 {offsets = [0, 32], sizes = [1, 16], strides = [1, 1]} : vector<1x128xf32> to vector<1x16xf32>
    %37 = vector.shape_cast %36 : vector<1x16xf32> to vector<1x1x16xf32>
    %38 = vector.extract_strided_slice %1 {offsets = [0, 96], sizes = [1, 16], strides = [1, 1]} : vector<1x128xf32> to vector<1x16xf32>
    %39 = vector.shape_cast %38 : vector<1x16xf32> to vector<1x1x16xf32>
    %c2 = arith.constant 2 : index
    %c0_22 = arith.constant 0 : index
    %c0_23 = arith.constant 0 : index
    %40 = vector.load %arg2[%c2, %c0_22, %c0_23] : memref<4x8x16xf32, #tpu.memory_space<vmem>>, vector<1x8x16xf32>
    %41 = vector.shape_cast %40 : vector<1x8x16xf32> to vector<8x16xf32>
    %42 = vector.shape_cast %41 : vector<8x16xf32> to vector<1x8x16xf32>
    %43 = vector.broadcast %37 : vector<1x1x16xf32> to vector<1x8x16xf32>
    %44 = arith.mulf %43, %42 : vector<1x8x16xf32>
    %c2_24 = arith.constant 2 : index
    %c0_25 = arith.constant 0 : index
    %c0_26 = arith.constant 0 : index
    %45 = vector.load %arg3[%c2_24, %c0_25, %c0_26] : memref<4x8x16xf32, #tpu.memory_space<vmem>>, vector<1x8x16xf32>
    %46 = vector.shape_cast %45 : vector<1x8x16xf32> to vector<8x16xf32>
    %47 = vector.shape_cast %46 : vector<8x16xf32> to vector<1x8x16xf32>
    %48 = vector.broadcast %39 : vector<1x1x16xf32> to vector<1x8x16xf32>
    %49 = arith.mulf %48, %47 : vector<1x8x16xf32>
    %50 = arith.addf %44, %49 : vector<1x8x16xf32>
    %c0_27 = arith.constant 0 : index
    %c0_28 = arith.constant 0 : index
    %c0_29 = arith.constant 0 : index
    %51 = vector.load %arg6[%c0_27, %c0_28, %c0_29] : memref<1x8x16xf32, #tpu.memory_space<vmem>>, vector<1x8x16xf32>
    %52 = arith.addf %51, %50 : vector<1x8x16xf32>
    %c0_30 = arith.constant 0 : index
    %c0_31 = arith.constant 0 : index
    %c0_32 = arith.constant 0 : index
    %53 = vector.load %arg6[%c0_30, %c0_31, %c0_32] : memref<1x8x16xf32, #tpu.memory_space<vmem>>, vector<1x8x16xf32>
    tpu.vector_store %arg6[%c0_30, %c0_31, %c0_32], %52 {strides = array<i32>} : memref<1x8x16xf32, #tpu.memory_space<vmem>>, vector<1x8x16xf32>,
    %54 = vector.extract_strided_slice %1 {offsets = [0, 48], sizes = [1, 16], strides = [1, 1]} : vector<1x128xf32> to vector<1x16xf32>
    %55 = vector.shape_cast %54 : vector<1x16xf32> to vector<1x1x16xf32>
    %56 = vector.extract_strided_slice %1 {offsets = [0, 112], sizes = [1, 16], strides = [1, 1]} : vector<1x128xf32> to vector<1x16xf32>
    %57 = vector.shape_cast %56 : vector<1x16xf32> to vector<1x1x16xf32>
    %c3 = arith.constant 3 : index
    %c0_33 = arith.constant 0 : index
    %c0_34 = arith.constant 0 : index
    %58 = vector.load %arg2[%c3, %c0_33, %c0_34] : memref<4x8x16xf32, #tpu.memory_space<vmem>>, vector<1x8x16xf32>
    %59 = vector.shape_cast %58 : vector<1x8x16xf32> to vector<8x16xf32>
    %60 = vector.shape_cast %59 : vector<8x16xf32> to vector<1x8x16xf32>
    %61 = vector.broadcast %55 : vector<1x1x16xf32> to vector<1x8x16xf32>
    %62 = arith.mulf %61, %60 : vector<1x8x16xf32>
    %c3_35 = arith.constant 3 : index
    %c0_36 = arith.constant 0 : index
    %c0_37 = arith.constant 0 : index
    %63 = vector.load %arg3[%c3_35, %c0_36, %c0_37] : memref<4x8x16xf32, #tpu.memory_space<vmem>>, vector<1x8x16xf32>
    %64 = vector.shape_cast %63 : vector<1x8x16xf32> to vector<8x16xf32>
    %65 = vector.shape_cast %64 : vector<8x16xf32> to vector<1x8x16xf32>
    %66 = vector.broadcast %57 : vector<1x1x16xf32> to vector<1x8x16xf32>
    %67 = arith.mulf %66, %65 : vector<1x8x16xf32>
    %68 = arith.addf %62, %67 : vector<1x8x16xf32>
    %c0_38 = arith.constant 0 : index
    %c0_39 = arith.constant 0 : index
    %c0_40 = arith.constant 0 : index
    %69 = vector.load %arg6[%c0_38, %c0_39, %c0_40] : memref<1x8x16xf32, #tpu.memory_space<vmem>>, vector<1x8x16xf32>
    %70 = arith.addf %69, %68 : vector<1x8x16xf32>
    %c0_41 = arith.constant 0 : index
    %c0_42 = arith.constant 0 : index
    %c0_43 = arith.constant 0 : index
    %71 = vector.load %arg6[%c0_41, %c0_42, %c0_43] : memref<1x8x16xf32, #tpu.memory_space<vmem>>, vector<1x8x16xf32>
    tpu.vector_store %arg6[%c0_41, %c0_42, %c0_43], %70 {strides = array<i32>} : memref<1x8x16xf32, #tpu.memory_space<vmem>>, vector<1x8x16xf32>,
    %c0_44 = arith.constant 0 : index
    %c0_45 = arith.constant 0 : index
    %72 = vector.load %arg4[%c0_44, %c0_45] : memref<128x64xf32, #tpu.memory_space<vmem>>, vector<128x64xf32>
    %cst = arith.constant dense<0.000000e+00> : vector<1x64xf32>
    %73 = tpu.matmul %1, %72, %cst {dimension_numbers = #tpu.dot_dimension_numbers<[1], [0], [0], [1], [0, 0, 1, 1], [], []>} : vector<1x128xf32>, vector<128x64xf32>, vector<1x64xf32> -> vector<1x64xf32>
    %c0_46 = arith.constant 0 : index
    %c0_47 = arith.constant 0 : index
    %74 = vector.load %arg5[%c0_46, %c0_47] : memref<64x64xf32, #tpu.memory_space<vmem>>, vector<64x64xf32>
    %cst_48 = arith.constant dense<0.000000e+00> : vector<1x64xf32>
    %75 = tpu.matmul %73, %74, %cst_48 {dimension_numbers = #tpu.dot_dimension_numbers<[1], [0], [0], [1], [0, 0, 1, 1], [], []>} : vector<1x64xf32>, vector<64x64xf32>, vector<1x64xf32> -> vector<1x64xf32>
    %76 = vector.shape_cast %75 : vector<1x64xf32> to vector<1x1x64xf32>
    %c0_49 = arith.constant 0 : index
    %c0_50 = arith.constant 0 : index
    %c0_51 = arith.constant 0 : index
    %77 = vector.load %arg7[%c0_49, %c0_50, %c0_51] : memref<1x1x64xf32, #tpu.memory_space<vmem>>, vector<1x1x64xf32>
    tpu.vector_store %arg7[%c0_49, %c0_50, %c0_51], %76 {strides = array<i32>} : memref<1x1x64xf32, #tpu.memory_space<vmem>>, vector<1x1x64xf32>,
    return
  }
  func.func @transform_0(%arg0: i32) -> (i32, i32, i32) {
    %c0_i32 = arith.constant 0 : i32
    %c0_i32_0 = arith.constant 0 : i32
    %c0_i32_1 = arith.constant 0 : i32
    return %arg0, %c0_i32, %c0_i32_0 : i32, i32, i32
  }
  func.func @transform_1(%arg0: i32) -> (i32, i32, i32) {
    %c0_i32 = arith.constant 0 : i32
    %c0_i32_0 = arith.constant 0 : i32
    %c0_i32_1 = arith.constant 0 : i32
    %c0_i32_2 = arith.constant 0 : i32
    return %c0_i32, %c0_i32_0, %c0_i32_1 : i32, i32, i32
  }
  func.func @transform_2(%arg0: i32) -> (i32, i32, i32) {
    %c0_i32 = arith.constant 0 : i32
    %c0_i32_0 = arith.constant 0 : i32
    %c0_i32_1 = arith.constant 0 : i32
    %c0_i32_2 = arith.constant 0 : i32
    return %c0_i32, %c0_i32_0, %c0_i32_1 : i32, i32, i32
  }
  func.func @transform_3(%arg0: i32) -> (i32, i32) {
    %c0_i32 = arith.constant 0 : i32
    %c0_i32_0 = arith.constant 0 : i32
    %c0_i32_1 = arith.constant 0 : i32
    return %c0_i32, %c0_i32_0 : i32, i32
  }
  func.func @transform_4(%arg0: i32) -> (i32, i32) {
    %c0_i32 = arith.constant 0 : i32
    %c0_i32_0 = arith.constant 0 : i32
    %c0_i32_1 = arith.constant 0 : i32
    return %c0_i32, %c0_i32_0 : i32, i32
  }
  func.func @transform_5(%arg0: i32) -> (i32, i32, i32) {
    %c0_i32 = arith.constant 0 : i32
    %c0_i32_0 = arith.constant 0 : i32
    %c0_i32_1 = arith.constant 0 : i32
    return %arg0, %c0_i32, %c0_i32_0 : i32, i32, i32
  }
  func.func @transform_6(%arg0: i32) -> (i32, i32, i32) {
    %c0_i32 = arith.constant 0 : i32
    %c0_i32_0 = arith.constant 0 : i32
    %c0_i32_1 = arith.constant 0 : i32
    return %arg0, %c0_i32, %c0_i32_0 : i32, i32, i32
  }
}

</mosaic_0001>

<bundles_post_ra>
// kernel: tpu_custom_call.1
= control target key start
LH: loop header
LB: loop body
LE: loop exit
PB: predicated region body
PF: predicated region fallthrough
CT: control target
= control target key end

     0   :  { %12 = vsyncpa [#allocation3], 0  ;;  %s1663_s0 = inlined_call_operand.hbm [shape: f32[2,1,128], index: 0, kind: input, shape index: {}]   ;;  %s1664_s1 = inlined_call_operand.hbm [shape: f32[4,8,16], index: 1, kind: input, shape index: {}]   ;;  %s1665_s2 = inlined_call_operand.hbm [shape: f32[4,8,16], index: 2, kind: input, shape index: {}]   ;;  %s1666_s3 = inlined_call_operand.hbm [shape: f32[128,64], index: 3, kind: input, shape index: {}]   ;;  %s1667_s4 = inlined_call_operand.hbm [shape: f32[64,64], index: 4, kind: input, shape index: {}]   ;;  %s1668_s5 = inlined_call_operand.hbm [shape: f32[2,8,16], index: 5, kind: output, shape index: {0}]   ;;  %s1669_s6 = inlined_call_operand.hbm [shape: f32[2,1,64], index: 6, kind: output, shape index: {1}]  }
   0x1   :  { %14 = vsyncpa [#allocation3 + $0x1], 0 }
   0x2   :  { %15 = vsyncpa [#allocation6], 0 }
   0x3   :  { %16 = vsyncpa [#allocation9], 0 }
   0x4   :  { %17 = vsyncpa [#allocation4], 0 }
   0x5   :  { %19 = vsyncpa [#allocation4 + $0x1], 0 }
   0x6   :  { %20 = vsyncpa [#allocation13], 0 }
   0x7   :  { %22 = vsyncpa [#allocation13 + $0x1], 0  ;;  %s1310_s21 = smov 0   ;;  %s1312_s22 = smov 0  }
   0x8   :  { %s1314_s23 = smov 0   ;;  %s1316_s24 = smov 0  }
   0x9 LB: > { %s1256_s25 = smov [#allocation5]   ;;  %s1331_s27 = sadd.s32 4294967295, %s1254_s24   ;;  %s1254_s24 = sphi %s1316_s24, %s1693_s24   ;;  %s1250_s23 = sphi %s1314_s23, %s1692_s23   ;;  %s1246_s22 = sphi %s1312_s22, %s1691_s22   ;;  %s1242_s21 = sphi %s1310_s21, %s1690_s21  }
   0xa   : > { %s207_s26 = sshll.u32 %s1256_s25, 4  ;;  %p767_p0 = scmp.ge.s32.totalorder %s1254_s24, 1  ;;  %s1336_s26 = int_to_ptr.vmem [resolvable:$true] %s207_s26 }
   0xb   : > { %p1670_p1 = scmp.eq.s32.totalorder %s1331_s27, 0  ;;  %p195_p2 = scmp.lt.s32.totalorder %s1254_s24, 3 }
   0xc   : > { %s1257_s29 = smov [#allocation8]   ;;  %s1258_s8 = smov [#allocation7]  }
   0xd   : > { %p1338_p3 = pnand %p767_p0, %p195_p2  ;;  %s233_s30 = sshll.u32 %s1257_s29, 4  ;;  %s1351_s30 = int_to_ptr.vmem [resolvable:$true] %s233_s30 }
   0xe   : > { %s220_s9 = sshll.u32 %s1258_s8, 4  ;;  %s1006_s12 = scalar_lea.hbm %s1664_s1, 512  ;;  %s1353_s9 = int_to_ptr.vmem [resolvable:$true] %s220_s9 }
   0xf   : > { %s1673_s28 = scalar_select %p1338_p3, 1, 0 }
  0x10   : > { %p924_p5 = pneg %p1338_p3  ;;  %p1007_p7 = scmp.ne.s32.totalorder %s1664_s1, %s1006_s12 }
  0x11   : > { %p1013_p11 = scmp.lt.u32.totalorder %s1006_s12, %s1664_s1 }
  0x12   : > { %p1347_p6 = pnand %p924_p5, %p1670_p1 }
  0x14   : > { %p1363_p8 = pneg %p1347_p6 }
  0x16   : > { %p1009_p9 = pnand %p1363_p8, %p1007_p7 }
  0x18   : > { %p1010_p10 = pneg %p1009_p9 }
  0x1a   : > { %p1015_p12 = pnand %p1013_p11, %p1010_p10 }
  0x1c   : > { %1018 = shalt.err (!%p1015_p12)
}
  0x1d   : > { %s1019_s18 = scalar_lea.vmem %s1336_s26, 512  ;;  %p1027_p5 = scmp.lt.s32.totalorder %s1336_s26, %s1336_s26 }
  0x1e   : > { %p1020_p13 = scmp.ne.s32.totalorder %s1336_s26, %s1019_s18  ;;  %p1028_p4 = scmp.lt.s32.totalorder %s1019_s18, %s1019_s18 }
  0x20   : > { %p1022_p0 = pnand %p1020_p13, %p1363_p8  ;;  %p1029_p7 = por %p1028_p4, %p1027_p5 }
  0x22   : > { %p1023_p2 = pneg %p1022_p0 }
  0x24   : > { %p1030_p9 = pnand %p1029_p7, %p1023_p2 }
  0x26   : > { %1033 = shalt.err (!%p1030_p9)
}
  0x27   : > { %s1259_s19 = smov 128   ;;  %s1260_s20 = smov 8  }
  0x28   : > { %927 = dma.hbm_to_vmem [thread:$0]  (!%p1347_p6), %s1664_s1, 512, %s1336_s26, [#allocation6], %s1259_s19, %s1259_s19, %s1260_s20  }
  0x29   : > { %s1034_s11 = scalar_lea.hbm %s1666_s3, 2048 }
  0x2a   : > { %p1035_p4 = scmp.ne.s32.totalorder %s1666_s3, %s1034_s11  ;;  %p1041_p12 = scmp.lt.u32.totalorder %s1034_s11, %s1666_s3 }
  0x2c   : > { %p1037_p10 = pnand %p1035_p4, %p1363_p8 }
  0x2e   : > { %p1038_p11 = pneg %p1037_p10 }
  0x30   : > { %p1043_p13 = pnand %p1041_p12, %p1038_p11 }
  0x32   : > { %1046 = shalt.err (!%p1043_p13)
}
  0x33   : > { %s1047_s26 = scalar_lea.vmem %s1351_s30, 2048  ;;  %p1055_p7 = scmp.lt.s32.totalorder %s1351_s30, %s1351_s30 }
  0x34   : > { %p1048_p0 = scmp.ne.s32.totalorder %s1351_s30, %s1047_s26  ;;  %p1056_p9 = scmp.lt.s32.totalorder %s1047_s26, %s1047_s26 }
  0x36   : > { %p1050_p2 = pnand %p1048_p0, %p1363_p8  ;;  %p1057_p4 = por %p1056_p9, %p1055_p7 }
  0x38   : > { %p1051_p5 = pneg %p1050_p2 }
  0x3a   : > { %p1058_p10 = pnand %p1057_p4, %p1051_p5 }
  0x3c   : > { %1061 = shalt.err (!%p1058_p10)
}
  0x3d   : > { %933 = dma.hbm_to_vmem [thread:$0]  (!%p1347_p6), %s1666_s3, 2048, %s1351_s30, [#allocation9], %s1259_s19, %s1259_s19, %s1260_s20  }
  0x3e   : > { %s1062_s8 = scalar_lea.hbm %s1665_s2, 512 }
  0x3f   : > { %p1063_p11 = scmp.ne.s32.totalorder %s1665_s2, %s1062_s8  ;;  %p1069_p0 = scmp.lt.u32.totalorder %s1062_s8, %s1665_s2 }
  0x41   : > { %p1065_p12 = pnand %p1063_p11, %p1363_p8 }
  0x43   : > { %p1066_p13 = pneg %p1065_p12 }
  0x45   : > { %p1071_p2 = pnand %p1069_p0, %p1066_p13 }
  0x47   : > { %1074 = shalt.err (!%p1071_p2)
}
  0x48   : > { %s1075_s30 = scalar_lea.vmem %s1353_s9, 512  ;;  %p1083_p4 = scmp.lt.s32.totalorder %s1353_s9, %s1353_s9 }
  0x49   : > { %p1076_p5 = scmp.ne.s32.totalorder %s1353_s9, %s1075_s30  ;;  %p1084_p10 = scmp.lt.s32.totalorder %s1075_s30, %s1075_s30 }
  0x4b   : > { %p1078_p7 = pnand %p1076_p5, %p1363_p8  ;;  %p1085_p11 = por %p1084_p10, %p1083_p4 }
  0x4d   : > { %p1079_p9 = pneg %p1078_p7 }
  0x4f   : > { %p1086_p12 = pnand %p1085_p11, %p1079_p9 }
  0x51   : > { %1089 = shalt.err (!%p1086_p12)
}
  0x52   : > { %930 = dma.hbm_to_vmem [thread:$0]  (!%p1347_p6), %s1665_s2, 512, %s1353_s9, [#allocation6], %s1259_s19, %s1259_s19, %s1260_s20  }
  0x53   : > { %s1261_s26 = smov [#allocation10]   ;;  %s1090_s29 = scalar_lea.hbm %s1667_s4, 1024 }
  0x54   : > { %s246_s17 = sshll.u32 %s1261_s26, 4  ;;  %p1091_p13 = scmp.ne.s32.totalorder %s1667_s4, %s1090_s29  ;;  %s247_s17 = int_to_ptr.vmem [resolvable:$true] %s246_s17 }
  0x55   : > { %p1097_p5 = scmp.lt.u32.totalorder %s1090_s29, %s1667_s4 }
  0x56   : > { %p1093_p0 = pnand %p1091_p13, %p1363_p8 }
  0x58   : > { %p1094_p2 = pneg %p1093_p0 }
  0x5a   : > { %p1099_p7 = pnand %p1097_p5, %p1094_p2 }
  0x5c   : > { %1102 = shalt.err (!%p1099_p7)
}
  0x5d   : > { %s1103_s9 = scalar_lea.vmem %s247_s17, 1024  ;;  %p1111_p11 = scmp.lt.s32.totalorder %s247_s17, %s247_s17 }
  0x5e   : > { %p1104_p9 = scmp.ne.s32.totalorder %s247_s17, %s1103_s9  ;;  %p1112_p12 = scmp.lt.s32.totalorder %s1103_s9, %s1103_s9 }
  0x60   : > { %p1106_p4 = pnand %p1104_p9, %p1363_p8  ;;  %p1113_p1 = por %p1112_p12, %p1111_p11 }
  0x62   : > { %p1107_p10 = pneg %p1106_p4 }
  0x64   : > { %p1114_p3 = pnand %p1113_p1, %p1107_p10 }
  0x66   : > { %1117 = shalt.err (!%p1114_p3)
}
  0x67   : > { %936 = dma.hbm_to_vmem [thread:$0]  (!%p1347_p6), %s1667_s4, 1024, %s247_s17, [#allocation9], %s1259_s19, %s1259_s19, %s1260_s20  }
  0x68   : > { %s766_s7 = sadd.s32 4294967294, %s1254_s24   ;;  %s1462_s15 = sadd.s32 1, %s1254_s24  }
  0x69   : > { %s32_s14 = ssub.s32 %s1254_s24, %s1462_s15  ;;  %s35_s16 = sadd.s32 1, %s1250_s23 }
  0x6a   : > { %p33_p1 = scmp.eq.s32.totalorder %s32_s14, 0  ;;  %p42_p3 = scmp.ne.s32.totalorder %s1250_s23, %s1246_s22 }
  0x6b   : > { %p43_p8 = scmp.eq.s32.totalorder %s1254_s24, 0  ;;  %p48_p13 = scmp.ne.s32.totalorder %s1246_s22, %s1242_s21 }
  0x6c   : > { %s1473_s26 = scalar_select %p33_p1, %s1250_s23, %s35_s16  }
  0x6d   : > { %p1475_p0 = por %p43_p8, %p42_p3  ;;  %p1677_p2 = scmp.eq.s32.totalorder %s1331_s27, 0 }
  0x6e   : > { %p156_p5 = scmp.eq.s32.totalorder %s1331_s27, 1  ;;  %p162_p7 = scmp.eq.s32.totalorder %s766_s7, 1 }
  0x6f   : > { %p1481_p6 = por %p1677_p2, %p48_p13  ;;  %p952_p9 = scmp.lt.s32.totalorder %s1254_s24, 2 }
  0x70   : > { %s260_s20 = sand.u32 1, %s1250_s23   ;;  %p1488_p4 = por %p156_p5, %p42_p3 }
  0x71   : > { %p1492_p10 = por %p162_p7, %p48_p13  ;;  %s773_s29 = sshll.u32 %s1254_s24, 4 }
  0x72   : > { %s1679_s17 = scalar_select %p1488_p4, 1, 0 }
  0x73   : > { %s1680_s25 = scalar_select %p1492_p10, 1, 0 }
  0x74   : > { %s263_s8 = scalar_lea.vmem [#allocation2], %s260_s20  ;;  %s1500_s9 = scalar_lea.hbm %s1663_s0, %s773_s29 }
  0x75   : > { %s270_s10 = sshll.u32 %s263_s8, 4  ;;  %p1506_p11 = pnand %p952_p9, %p1475_p0  ;;  %s1502_s10 = int_to_ptr.vmem [resolvable:$true] %s270_s10 }
  0x76   : > { %s261_s30 = scalar_lea.sflag [#allocation3], %s260_s20  ;;  %s1118_s7 = scalar_lea.hbm %s1500_s9, 16 }
  0x77   : > { %p1119_p12 = scmp.ne.s32.totalorder %s1500_s9, %s1118_s7  ;;  %p1120_p1 = pneg %p1506_p11 }
  0x78   : > { %s1123_s29 = scalar_lea.hbm %s1663_s0, 32  ;;  %p1124_p13 = scmp.lt.u32.totalorder %s1500_s9, %s1663_s0 }
  0x79   : > { %p1121_p3 = pnand %p1120_p1, %p1119_p12  ;;  %p1125_p0 = scmp.lt.u32.totalorder %s1123_s29, %s1118_s7 }
  0x7a   : > { %p1127_p5 = scmp.lt.u32.totalorder %s1118_s7, %s1500_s9 }
  0x7b   : > { %p1122_p8 = pneg %p1121_p3  ;;  %p1126_p2 = por %p1125_p0, %p1124_p13 }
  0x7d   : > { %p1128_p7 = por %p1127_p5, %p1126_p2 }
  0x7f   : > { %p1129_p9 = pnand %p1128_p7, %p1122_p8 }
  0x81   : > { %1132 = shalt.err (!%p1129_p9)
}
  0x82   : > { %s1133_s20 = scalar_lea.vmem %s1502_s10, 16  ;;  %s1262_s11 = smov [#allocation2]  }
  0x83   : > { %p1134_p12 = scmp.ne.s32.totalorder %s1502_s10, %s1133_s20  ;;  %s1138_s12 = sshll.u32 %s1262_s11, 4  ;;  %s1139_s12 = int_to_ptr.vmem [resolvable:$false] %s1138_s12 }
  0x84   : > { %s1140_s14 = scalar_lea.vmem %s1139_s12, 32  ;;  %p1141_p4 = scmp.lt.s32.totalorder %s1502_s10, %s1139_s12 }
  0x85   : > { %p1136_p3 = pnand %p1134_p12, %p1120_p1  ;;  %p1142_p13 = scmp.lt.s32.totalorder %s1140_s14, %s1133_s20 }
  0x87   : > { %p1137_p10 = pneg %p1136_p3  ;;  %p1143_p0 = por %p1142_p13, %p1141_p4 }
  0x89   : > { %p1144_p2 = pnand %p1143_p0, %p1137_p10 }
  0x8b   : > { %1147 = shalt.err (!%p1144_p2)
}
  0x8c   : > { %940 = dma.hbm_to_vmem [thread:$0]  (!%p1506_p11), %s1500_s9, 16, %s1502_s10, %s261_s30  }
  0x8d   : > { %p1682_p8 = scmp.ne.s32.totalorder %s1673_s28, 0 }
  0x8e   : > { %s1538_s7 = sand.u32 (!%p1682_p8), 1, %s1246_s22  }
  0x8f   : > { %279 = sbr.rel (%p1682_p8) target bundleno = 629 (0x275), region = 40  ;;  %s282_s16 = scalar_lea.sflag (!%p1682_p8), [#allocation3], %s1538_s7 }
  0x90   : > { %s284_s29 = scalar_lea.vmem (!%p1682_p8), [#allocation2], %s1538_s7 }
  0x96   : > { %1221 = dma.done.wait (%p1481_p6), %s282_s16, 16  }
  0x97   : > { %1223 = vsyncadd (%p1481_p6), %s282_s16, 4294967280  ;;  %p1683_p4 = scmp.eq.s32.totalorder %s1331_s27, 0 }
  0x99   : > { %1225 = dma.done.wait (%p1683_p4), [#allocation6], 1024   ;;  %p1684_p10 = pmov %p1683_p4 }
  0x9a   : > { %p1685_p11 = pmov %p1683_p4 }
  0x9b   : > { %1227 = vsyncadd (%p1684_p10), [#allocation6], 4294966272 }
  0x9c   : > { %1229 = dma.done.wait (%p1685_p11), [#allocation9], 3072   ;;  %p1686_p1 = pmov %p1683_p4 }
  0x9d   : > { %v1263_v0 = vmov 0.0|0.0   ;;  %vm1264_vm0 = vmmov 0   ;;  %v1265_v1 = vmov 0.0   ;;  %v432_v2 = vld [vmem:[#allocation8] sm:$0xff]  ;;  %v433_v3 = vld [vmem:[#allocation8 + $0x8] sm:$0xff]  ;;  %v434_v4 = vld [vmem:[#allocation8 + $0x10] sm:$0xff]  ;;  %v335_v46 = vlaneseq }
  0x9e   : > { %1231 = vsyncadd (%p1686_p1), [#allocation9], 4294964224  ;;  %866 = vmatprep.subr.bf16.mxu0 %v1263_v0  ;;  %844 = vmatprep.mubr.msk.f32.mxu0 %vm1264_vm0, %v1265_v1  ;;  %v867_v5 = vpack.c.bf16 %v433_v3, %v432_v2  ;;  %v435_v6 = vld [vmem:[#allocation8 + $0x18] sm:$0xff]  ;;  %v436_v8 = vld [vmem:[#allocation8 + $0x20] sm:$0xff]  ;;  %s1266_s28 = smov 80   ;;  %s1267_s19 = smov 112  }
  0x9f   : > { %890 = vmatprep.subr.bf16.mxu1 %v1263_v0  ;;  %863 = vmatprep.mubr.msk.f32.mxu1 %vm1264_vm0, %v1265_v1  ;;  %v870_v7 = vpack.c.bf16 %v435_v6, %v434_v4  ;;  %v437_v9 = vld [vmem:[#allocation8 + $0x28] sm:$0xff]  ;;  %v414_v11 = vld [vmem:[#allocation7 + $0x18] sm:$0xff]  ;;  %v438_v13 = vld [vmem:[#allocation8 + $0x30] sm:$0xff]  ;;  %s1268_s10 = smov 96   ;;  %s1269_s9 = smov 64   ;;  %v336_v47 = vshrl.u32 %v335_v46, 7 }
  0xa0   : > { %868 = vmatpush3.bf16.msra.mxu0 %v867_v5  ;;  %v362_v10 = vld [vmem:[#allocation7 + $0x8] sm:$0xff]  ;;  %v873_v12 = vpack.c.bf16 %v437_v9, %v436_v8  ;;  %v439_v14 = vld [vmem:[#allocation8 + $0x38] sm:$0xff]  ;;  %v388_v15 = vld [vmem:[#allocation7 + $0x10] sm:$0xff]  ;;  %416 = vrot.lane.b32.xlu1 %v414_v11, %s1267_s19  ;;  %s1270_s13 = smov 16   ;;  %s1271_s30 = smov 32   ;;  %vm352_vm1 = vcmask 130048  }
  0xa1   : > { %869 = vmatprep.subr.bf16.mxu0 %v1263_v0  ;;  %364 = vrot.lane.b32.xlu0 %v362_v10, %s1266_s28  ;;  %v341_v16 = vld [vmem:[#allocation7] sm:$0xff]  ;;  %v519_v18 = vld [vmem:[#allocation10 + $0x8] sm:$0xff]  ;;  %v520_v20 = vld [vmem:[#allocation10 + $0x10] sm:$0xff]  ;;  %v876_v22 = vpack.c.bf16 %v439_v14, %v438_v13  ;;  %s1272_s18 = smov 48   ;;  %v337_v48 = vsub.s32 0, %v336_v47  ;;  %s779_s8 = sshll.u32 %s1538_s7, 3 }
  0xa2   : > { %v518_v17 = vld [vmem:[#allocation10] sm:$0xff]  ;;  %v521_v21 = vld [vmem:[#allocation10 + $0x18] sm:$0xff]  ;;  %v355_v23 = vld [vmem:[#allocation5 + $0x8] sm:$0xff]  ;;  %vm526_vm2 = vcmask 523264   ;;  %s325_s20 = scalar_lea.vmem [#allocation11], %s779_s8  ;;  %s782_s11 = sshll.u32 %s1331_s27, 7 }
  0xa3   : > { %v891_v19 = vpack.c.bf16 %v519_v18, %v518_v17  ;;  %v440_v24 = vld [vmem:[#allocation8 + $0x40] sm:$0xff]  ;;  %v441_v25 = vld [vmem:[#allocation8 + $0x48] sm:$0xff]  ;;  %v894_v26 = vpack.c.bf16 %v521_v21, %v520_v20  ;;  %v381_v30 = vld [vmem:[#allocation5 + $0x10] sm:$0xff]  ;;  %s620_s12 = sshll.u32 %s325_s20, 4  ;;  %p1687_p5 = scmp.ne.s32.totalorder %s1679_s17, 0  ;;  %s1589_s12 = int_to_ptr.vmem [resolvable:$true] %s620_s12 }
  0xa4   : > { %871 = vmatpush3.bf16.msra.mxu0 %v870_v7  ;;  %343 = vrot.lane.b32.xlu1 %v341_v16, %s1269_s9  ;;  %v522_v27 = vld [vmem:[#allocation10 + $0x20] sm:$0xff]  ;;  %v523_v28 = vld [vmem:[#allocation10 + $0x28] sm:$0xff]  ;;  %v879_v29 = vpack.c.bf16 %v441_v25, %v440_v24  ;;  %v442_v31 = vld [vmem:[#allocation8 + $0x50] sm:$0xff] }
  0xa5   : > { %872 = vmatprep.subr.bf16.mxu0 %v1263_v0  ;;  %390 = vrot.lane.b32.xlu0 %v388_v15, %s1268_s10  ;;  %v443_v32 = vld [vmem:[#allocation8 + $0x58] sm:$0xff]  ;;  %v897_v33 = vpack.c.bf16 %v523_v28, %v522_v27  ;;  %v524_v34 = vld [vmem:[#allocation10 + $0x30] sm:$0xff]  ;;  %v444_v38 = vld [vmem:[#allocation8 + $0x60] sm:$0xff] }
  0xa6   : > { %892 = vmatpush3.bf16.msra.mxu1 %v891_v19  ;;  %v525_v35 = vld [vmem:[#allocation10 + $0x38] sm:$0xff]  ;;  %v882_v36 = vpack.c.bf16 %v443_v32, %v442_v31  ;;  %v445_v39 = vld [vmem:[#allocation8 + $0x68] sm:$0xff]  ;;  %v446_v42 = vld [vmem:[#allocation8 + $0x70] sm:$0xff] }
  0xa7   : > { %893 = vmatprep.subr.bf16.mxu1 %v1263_v0  ;;  %v407_v37 = vld [vmem:[#allocation5 + $0x18] sm:$0xff]  ;;  %v900_v40 = vpack.c.bf16 %v525_v35, %v524_v34  ;;  %v885_v41 = vpack.c.bf16 %v445_v39, %v444_v38  ;;  %v333_v61 = vld [vmem:[#allocation5] sm:$0xff] }
  0xa8   : > { %874 = vmatpush3.bf16.msra.mxu0 %v873_v12  ;;  %v447_v43 = vld [vmem:[#allocation8 + $0x78] sm:$0xff] }
  0xa9   : > { %875 = vmatprep.subr.bf16.mxu0 %v1263_v0  ;;  %357 = vrot.lane.b32.xlu0 %v355_v23, %s1270_s13  ;;  %v888_v44 = vpack.c.bf16 %v447_v43, %v446_v42  ;;  %v332_v45 = vld [vmem:[%s284_s29] sm:$0x1]  ;;  %s1587_s29 = scalar_lea.hbm %s1668_s5, %s782_s11 }
  0xaa   : > { %895 = vmatpush3.bf16.msra.mxu1 %v894_v26  ;;  %v338_v49 = vrot.slane %v332_v45, %v337_v48 }
  0xab   : > { %896 = vmatprep.subr.bf16.mxu1 %v1263_v0 }
  0xac   : > { %877 = vmatpush3.bf16.msra.mxu0 %v876_v22  ;;  %v340_v2 = vmul.f32 %v338_v49, %v333_v61 }
  0xad   : > { %878 = vmatprep.subr.bf16.mxu0 %v1263_v0  ;;  %383 = vrot.lane.b32.xlu0 %v381_v30, %s1271_s30 }
  0xae   : > { %898 = vmatpush3.bf16.msra.mxu1 %v897_v33 }
  0xaf   : > { %899 = vmatprep.subr.bf16.mxu1 %v1263_v0 }
  0xb0   : > { %880 = vmatpush3.bf16.msra.mxu0 %v879_v29 }
  0xb1   : > { %881 = vmatprep.subr.bf16.mxu0 %v1263_v0  ;;  %409 = vrot.lane.b32.xlu0 %v407_v37, %s1272_s18 }
  0xb2   : > { %901 = vmatpush3.bf16.msra.mxu1 %v900_v40 }
  0xb4   : > { %883 = vmatpush3.bf16.msra.mxu0 %v882_v36 }
  0xb5   : > { %884 = vmatprep.subr.bf16.mxu0 %v1263_v0 }
  0xb8   : > { %886 = vmatpush3.bf16.msra.mxu0 %v885_v41 }
  0xb9   : > { %887 = vmatprep.subr.bf16.mxu0 %v1263_v0 }
  0xbc   : > { %889 = vmatpush3.bf16.msra.mxu0 %v888_v44 }
  0xbf   : > { %845 = vmatmul.mubr.f32.vlgmr.msra.gmra.mrb[0].mxu0 %v332_v45 }
 0x112   : > { %v417_v52 = vpop.permute.xlu1 %416 }
 0x113   : > { %v365_v50 = vpop.permute.xlu0 %364  ;;  %v419_v57 = vmul.f32 %v417_v52, %v338_v49 }
 0x114   : > { %v367_v51 = vmul.f32 %v365_v50, %v338_v49 }
 0x116   : > { %369 = vrot.lane.b32.xlu1 %v367_v51, %s1269_s9  ;;  %v344_v55 = vpop.permute.xlu1 %343 }
 0x117   : > { %v391_v53 = vpop.permute.xlu0 %390  ;;  %v346_v56 = vmul.f32 %v344_v55, %v338_v49 }
 0x118   : > { %v393_v54 = vmul.f32 %v391_v53, %v338_v49 }
 0x119   : > { %348 = vrot.lane.b32.xlu0 %v346_v56, %s1269_s9 }
 0x11a   : > { %395 = vrot.lane.b32.xlu1 %v393_v54, %s1269_s9 }
 0x11b   : > { %v358_v58 = vpop.permute.xlu0 %357 }
 0x11c   : > { %v360_v59 = vmul.f32 %v358_v58, %v338_v49 }
 0x11e   : > { %421 = vrot.lane.b32.xlu1 %v419_v57, %s1269_s9 }
 0x11f   : > { %v384_v60 = vpop.permute.xlu0 %383 }
 0x120   : > { %v386_v0 = vmul.f32 %v384_v60, %v338_v49 }
 0x123   : > { %v410_v1 = vpop.permute.xlu0 %409 }
 0x124   : > { %v412_v5 = vmul.f32 %v410_v1, %v338_v49 }
 0x188   : > { %v370_v62 = vpop.permute.xlu1 %369 }
 0x189   : > { %v372_v63 = vadd.f32 %v370_v62, %v360_v59 }
 0x18b   : > { %375 = vrot.lane.b32.xlu1 %v372_v63, %s1267_s19  ;;  %v349_v6 = vpop.permute.xlu0 %348  ;;  %s1148_s19 = scalar_lea.vmem %s1589_s12, 128 }
 0x18c   : > { %v396_v3 = vpop.permute.xlu1 %395  ;;  %v351_v7 = vadd.f32 %v349_v6, %v340_v2  ;;  %p1149_p6 = scmp.ne.s32.totalorder %s1589_s12, %s1148_s19 }
 0x18d   : > { %v398_v4 = vadd.f32 %v396_v3, %v386_v0 }
 0x18e   : > { %353 = vst.msk [vmem:[%s325_s20] sm:$0xff] %vm352_vm1, %v351_v7  ;;  %p1150_p7 = pnand %p1149_p6, %p1687_p5 }
 0x18f   : > { %401 = vrot.lane.b32.xlu0 %v398_v4, %s1268_s10  ;;  %s1273_s10 = smov [#allocation11]  }
 0x190   : > { %v422_v9 = vpop.permute.xlu1 %421  ;;  %p1151_p9 = pneg %p1150_p7  ;;  %s1152_s9 = sshll.u32 %s1273_s10, 4  ;;  %s1153_s9 = int_to_ptr.vmem [resolvable:$false] %s1152_s9 }
 0x191   : > { %v424_v11 = vadd.f32 %v422_v9, %v412_v5  ;;  %s1154_s13 = scalar_lea.vmem %s1153_s9, 256  ;;  %p1155_p12 = scmp.lt.s32.totalorder %s1589_s12, %s1153_s9 }
 0x192   : > { %v514_v8 = vpop.f32.mrb[0].mxu0  ;;  %p1156_p3 = scmp.lt.s32.totalorder %s1154_s13, %s1148_s19 }
 0x193   : > { %v846_v10 = vpop.f32.mrb[1].mxu0  ;;  %864 = vmatmul.mubr.msk.f32.vlgmr.msra.gmra.mrb[0].mxu1 %vm526_vm2, %v514_v8  ;;  %427 = vrot.lane.b32.xlu1 %v424_v11, %s1266_s28  ;;  %s603_s28 = scalar_lea.sflag [#allocation4], %s1538_s7 }
 0x194   : > { %p1157_p13 = por %p1156_p3, %p1155_p12 }
 0x195   : > { %v373_v12 = vld [vmem:[%s325_s20] sm:$0xff] }
 0x196   : > { %p1158_p0 = pnand %p1157_p13, %p1151_p9 }
 0x1fd   : > { %v376_v13 = vpop.permute.xlu1 %375 }
 0x1fe   : > { %v378_v14 = vadd.f32 %v376_v13, %v373_v12 }
 0x200   : > { %379 = vst.msk [vmem:[%s325_s20] sm:$0xff] %vm352_vm1, %v378_v14 }
 0x201   : > { %v402_v15 = vpop.permute.xlu0 %401 }
 0x205   : > { %v428_v18 = vpop.permute.xlu1 %427 }
 0x207   : > { %v399_v16 = vld [vmem:[%s325_s20] sm:$0xff] }
 0x208   : > { %v404_v17 = vadd.f32 %v402_v15, %v399_v16 }
 0x20a   : > { %405 = vst.msk [vmem:[%s325_s20] sm:$0xff] %vm352_vm1, %v404_v17 }
 0x211   : > { %v425_v19 = vld [vmem:[%s325_s20] sm:$0xff] }
 0x212   : > { %v430_v20 = vadd.f32 %v428_v18, %v425_v19 }
 0x214   : > { %431 = vst.msk [vmem:[%s325_s20] sm:$0xff] %vm352_vm1, %v430_v20 }
 0x215   : > { %1161 = shalt.err (!%p1158_p0)
}
 0x216   : > { %s1162_s30 = scalar_lea.hbm %s1587_s29, 128  ;;  %s1166_s20 = scalar_lea.hbm %s1668_s5, 256 }
 0x217   : > { %p1163_p2 = scmp.ne.s32.totalorder %s1587_s29, %s1162_s30  ;;  %p1167_p10 = scmp.lt.u32.totalorder %s1587_s29, %s1668_s5 }
 0x218   : > { %p1168_p11 = scmp.lt.u32.totalorder %s1166_s20, %s1162_s30  ;;  %p1170_p6 = scmp.lt.u32.totalorder %s1162_s30, %s1587_s29 }
 0x219   : > { %p1164_p8 = pnand %p1163_p2, %p1687_p5 }
 0x21a   : > { %p1169_p1 = por %p1168_p11, %p1167_p10 }
 0x21b   : > { %p1165_p4 = pneg %p1164_p8 }
 0x21c   : > { %p1171_p7 = por %p1170_p6, %p1169_p1 }
 0x21e   : > { %p1172_p9 = pnand %p1171_p7, %p1165_p4 }
 0x220   : > { %1175 = shalt.err (!%p1172_p9)
}
 0x221   : > { %920 = dma.vmem_to_hbm [thread:$0]  (%p1687_p5), %s1589_s12, 128, %s1587_s29, %s603_s28   ;;  %vm600_vm3 = vcmask 516096  }
 0x222   : > { %s783_s16 = sshll.u32 %s1331_s27, 4  ;;  %s331_s19 = scalar_lea.vmem [#allocation12], %s1538_s7 }
 0x223   : > { %s633_s10 = sshll.u32 %s331_s19, 4  ;;  %s1619_s30 = scalar_lea.hbm %s1669_s6, %s783_s16  ;;  %s1621_s10 = int_to_ptr.vmem [resolvable:$true] %s633_s10 }
 0x224   : > { %s608_s18 = scalar_lea.sflag [#allocation13], %s1538_s7  ;;  %s1176_s8 = scalar_lea.vmem %s1621_s10, 16 }
 0x225   : > { %p1177_p12 = scmp.ne.s32.totalorder %s1621_s10, %s1176_s8  ;;  %s1274_s27 = smov [#allocation12]  }
 0x226   : > { %s1180_s12 = sshll.u32 %s1274_s27, 4  ;;  %s1181_s12 = int_to_ptr.vmem [resolvable:$false] %s1180_s12 }
 0x227   : > { %p1178_p3 = pnand %p1177_p12, %p1687_p5  ;;  %s1182_s29 = scalar_lea.vmem %s1181_s12, 32 }
 0x228   : > { %p1183_p0 = scmp.lt.s32.totalorder %s1621_s10, %s1181_s12  ;;  %p1184_p2 = scmp.lt.s32.totalorder %s1182_s29, %s1176_s8 }
 0x229   : > { %p1179_p13 = pneg %p1178_p3 }
 0x22a   : > { %p1185_p8 = por %p1184_p2, %p1183_p0 }
 0x22c   : > { %p1186_p4 = pnand %p1185_p8, %p1179_p13 }
 0x266   : > { %v596_v21 = vpop.f32.mrb[0].mxu1 }
 0x267   : > { %601 = vst.msk [vmem:[%s331_s19] sm:$0x1] %vm600_vm3, %v596_v21  ;;  %v865_v22 = vpop.f32.mrb[1].mxu1 }
 0x268   : > { %1189 = shalt.err (!%p1186_p4)
}
 0x269   : > { %s1190_s7 = scalar_lea.hbm %s1619_s30, 16  ;;  %s1194_s11 = scalar_lea.hbm %s1669_s6, 32 }
 0x26a   : > { %p1191_p10 = scmp.ne.s32.totalorder %s1619_s30, %s1190_s7  ;;  %p1195_p6 = scmp.lt.u32.totalorder %s1619_s30, %s1669_s6 }
 0x26b   : > { %p1196_p7 = scmp.lt.u32.totalorder %s1194_s11, %s1190_s7  ;;  %p1198_p12 = scmp.lt.u32.totalorder %s1190_s7, %s1619_s30 }
 0x26c   : > { %p1192_p11 = pnand %p1191_p10, %p1687_p5 }
 0x26d   : > { %p1197_p9 = por %p1196_p7, %p1195_p6 }
 0x26e   : > { %p1193_p1 = pneg %p1192_p11 }
 0x26f   : > { %p1199_p3 = por %p1198_p12, %p1197_p9 }
 0x271   : > { %p1200_p13 = pnand %p1199_p3, %p1193_p1 }
 0x273   : > { %1203 = shalt.err (!%p1200_p13)
}
 0x274   : > { %921 = dma.vmem_to_hbm [thread:$0]  (%p1687_p5), %s1621_s10, 16, %s1619_s30, %s608_s18  }
 0x275 PF: > { %s645_s19 = sand.u32 1, %s1242_s21   ;;  %p1688_p0 = scmp.ne.s32.totalorder %s1680_s25, 0 }
 0x276   : > { %p1689_p2 = scmp.ge.s32.totalorder %s1254_s24, 2  ;;  %s646_s9 = scalar_lea.sflag [#allocation4], %s645_s19 }
 0x278   : > { %p942_p8 = pnand %p1689_p2, %p1688_p0 }
 0x27a   : > { %1233 = dma.done.wait (!%p942_p8), %s646_s9, 128  }
 0x27b   : > { %1235 = vsyncadd (!%p942_p8), %s646_s9, 4294967168  ;;  %s655_s13 = scalar_lea.sflag [#allocation13], %s645_s19 }
 0x27c   : > { %1237 = dma.done.wait (!%p942_p8), %s655_s13, 16  }
 0x27d   : > { %1239 = vsyncadd (!%p942_p8), %s655_s13, 4294967280  ;;  %p25_p5 = scmp.ge.s32.totalorder %s1462_s15, 4   ;;  %s1690_s21 = smov %s1246_s22 }
 0x27e   : > { %s1691_s22 = smov %s1250_s23  ;;  %s1692_s23 = smov %s1473_s26 }
 0x27f   : > { %s1693_s24 = smov %s1462_s15  ;;  %27 = sbr.rel (!%p25_p5) target bundleno = 9 (0x9), region = 124 }
 0x286   :  { %659 = vsyncpa [#allocation3], 1 }
 0x287   :  { %661 = vsyncpa [#allocation3 + $0x1], 1 }
 0x288   :  { %662 = vsyncpa [#allocation6], 1 }
 0x289   :  { %663 = vsyncpa [#allocation9], 1 }
 0x28a   :  { %664 = vsyncpa [#allocation4], 1 }
 0x28b   :  { %666 = vsyncpa [#allocation4 + $0x1], 1 }
 0x28c   :  { %667 = vsyncpa [#allocation13], 1 }
 0x28d   :  { %669 = vsyncpa [#allocation13 + $0x1], 1 }

</bundles_post_ra>
